<compile_context>
chip_gen: v6e
topology: v6e:2x2x1
jax: 0.10.0
libtpu: 0.0.40
codegen_flags: <defaults>
</compile_context>

<pallas_src>
import math
import functools

import jax
import jax.numpy as jnp
from jax.experimental import pallas as pl
from jax.experimental.pallas import tpu as pltpu

CLS_CODEPOINT = 0xE000  # CodepointTokenizer.CLS


def _round_up(x, m):
    return (x + m - 1) // m * m


def _gelu(x):
    # TODO(synk): PyTorch nn.GELU default is the exact erf form; tanh
    # approximation is used here for Mosaic-safe lowering inside the kernel.
    c = math.sqrt(2.0 / math.pi)
    return 0.5 * x * (1.0 + jnp.tanh(c * (x + 0.044715 * x * x * x)))


# --------------------------- tiled linear kernel ----------------------------
# y = [LN](act(x @ w + b) [+ residual])   -- act / residual / LN all optional.

def _linear_kernel(*refs, act, fuse_res, fuse_ln, eps):
    x_ref, w_ref, b_ref = refs[0], refs[1], refs[2]
    idx = 3
    res_ref = g_ref = beta_ref = None
    if fuse_res:
        res_ref = refs[idx]; idx += 1
    if fuse_ln:
        g_ref, beta_ref = refs[idx], refs[idx + 1]; idx += 2
    o_ref = refs[idx]
    acc_ref = refs[idx + 1]

    k = pl.program_id(2)

    @pl.when(k == 0)
    def _():
        acc_ref[...] = jnp.zeros_like(acc_ref)

    # bf16 MXU inputs, f32 accumulation.
    acc_ref[...] += jnp.dot(x_ref[...].astype(jnp.bfloat16),
                            w_ref[...].astype(jnp.bfloat16),
                            preferred_element_type=jnp.float32)

    @pl.when(k == pl.num_programs(2) - 1)
    def _():
        y = acc_ref[...] + b_ref[...].astype(jnp.float32)
        if act == "gelu":
            y = _gelu(y)
        elif act == "tanh":
            y = jnp.tanh(y)
        if fuse_res:
            y = y + res_ref[...].astype(jnp.float32)
        if fuse_ln:
            mu = jnp.mean(y, axis=-1, keepdims=True)
            var = jnp.mean((y - mu) ** 2, axis=-1, keepdims=True)
            y = (y - mu) * jax.lax.rsqrt(var + eps) * g_ref[...] + beta_ref[...]
        o_ref[...] = y.astype(o_ref.dtype)


def linear(x, w, b, act=None, residual=None, ln=None, eps=1e-5,
           tm_pref=256, tn_pref=512, tk_pref=512):
    """y = [LN](act(x @ w + b) [+ residual]).  x: (..., K), w: (K, N), b: (N,)."""
    lead = x.shape[:-1]
    K = x.shape[-1]
    N = w.shape[1]
    x2 = x.reshape(-1, K).astype(jnp.float32)
    M = x2.shape[0]

    # Tile selection: full-dim blocks for small dims (valid per Mosaic rules),
    # 128/8-aligned tiles with zero-padding for large dims.
    if M <= tm_pref:
        tm, Mp = M, M
    else:
        tm, Mp = tm_pref, _round_up(M, tm_pref)
    if K <= tk_pref:
        tk, Kp = K, K
    else:
        tk, Kp = tk_pref, _round_up(K, tk_pref)
    if ln is not None or N <= tn_pref:
        tn, Np = N, N          # fused LN needs the full feature row in one block
    else:
        tn, Np = tn_pref, _round_up(N, tn_pref)

    xp = x2 if (Mp == M and Kp == K) else jnp.pad(x2, ((0, Mp - M), (0, Kp - K)))
    wp = w if (Kp == K and Np == N) else jnp.pad(w, ((0, Kp - K), (0, Np - N)))
    bp = b.reshape(1, N)
    if Np != N:
        bp = jnp.pad(bp, ((0, 0), (0, Np - N)))

    nm, nn, nk = Mp // tm, Np // tn, Kp // tk

    in_specs = [
        pl.BlockSpec((tm, tk), lambda i, j, k: (i, k)),
        pl.BlockSpec((tk, tn), lambda i, j, k: (k, j)),
        pl.BlockSpec((1, tn), lambda i, j, k: (0, j)),
    ]
    args = [xp, wp, bp]
    if residual is not None:
        r2 = residual.reshape(-1, N).astype(jnp.float32)
        if Mp != M or Np != N:
            r2 = jnp.pad(r2, ((0, Mp - M), (0, Np - N)))
        in_specs.append(pl.BlockSpec((tm, tn), lambda i, j, k: (i, j)))
        args.append(r2)
    if ln is not None:
        g, beta = ln
        in_specs.append(pl.BlockSpec((1, tn), lambda i, j, k: (0, j)))
        in_specs.append(pl.BlockSpec((1, tn), lambda i, j, k: (0, j)))
        args.append(g.reshape(1, N))
        args.append(beta.reshape(1, N))

    out = pl.pallas_call(
        functools.partial(_linear_kernel, act=act,
                          fuse_res=residual is not None,
                          fuse_ln=ln is not None, eps=eps),
        out_shape=jax.ShapeDtypeStruct((Mp, Np), jnp.float32),
        grid=(nm, nn, nk),
        in_specs=in_specs,
        out_specs=pl.BlockSpec((tm, tn), lambda i, j, k: (i, j)),
        scratch_shapes=[pltpu.VMEM((tm, tn), jnp.float32)],
        compiler_params=pltpu.CompilerParams(
            dimension_semantics=("parallel", "parallel", "arbitrary"),
            vmem_limit_bytes=64 * 1024 * 1024),
    )(*args)

    out = out[:M, :N]
    return out.reshape(lead + (N,))


# ----------------------------- attention kernel -----------------------------
# Grid over (batch, head); per-head q/k/v blocks; bias built in-kernel from the
# (B, S) key-padding mask (+ optional static block-local window).

def _attn_kernel(q_ref, k_ref, v_ref, m_ref, o_ref, *, scale, window):
    q = q_ref[...].astype(jnp.float32) * scale           # (S, Dh)
    kk = k_ref[...].astype(jnp.float32)                  # (S, Dh)
    s = jax.lax.dot_general(q, kk, (((1,), (1,)), ((), ())),
                            preferred_element_type=jnp.float32)  # (S, S)
    # key padding bias: mask value > 0.5 means "ignore this key"
    s = s + jnp.where(m_ref[...] > 0.5, -1e9, 0.0)        # (1,S) broadcast
    if window is not None:
        S = s.shape[0]
        r = jax.lax.broadcasted_iota(jnp.int32, (S, S), 0) // window
        c = jax.lax.broadcasted_iota(jnp.int32, (S, S), 1) // window
        s = jnp.where(r == c, s, s - 1e9)
    m = jnp.max(s, axis=-1, keepdims=True)
    p = jnp.exp(s - m)
    denom = jnp.sum(p, axis=-1, keepdims=True)
    ctx = jnp.dot(p.astype(jnp.bfloat16), v_ref[...].astype(jnp.bfloat16),
                  preferred_element_type=jnp.float32)     # (S, Dh)
    o_ref[...] = (ctx * pl.reciprocal(denom, approx=True)).astype(o_ref.dtype)


def attention(q, k, v, key_pad_mask, window=None):
    """q,k,v: (B, H, S, Dh); key_pad_mask: (B, S) bool, True = ignore key."""
    B, H, S, Dh = q.shape
    mask_f = key_pad_mask.astype(jnp.float32).reshape(B, 1, S)
    return pl.pallas_call(
        functools.partial(_attn_kernel, scale=1.0 / math.sqrt(Dh), window=window),
        out_shape=jax.ShapeDtypeStruct((B, H, S, Dh), jnp.float32),
        grid=(B, H),
        in_specs=[
            pl.BlockSpec((None, None, S, Dh), lambda b, h: (b, h, 0, 0)),
            pl.BlockSpec((None, None, S, Dh), lambda b, h: (b, h, 0, 0)),
            pl.BlockSpec((None, None, S, Dh), lambda b, h: (b, h, 0, 0)),
            pl.BlockSpec((None, 1, S), lambda b, h: (b, 0, 0)),
        ],
        out_specs=pl.BlockSpec((None, None, S, Dh), lambda b, h: (b, h, 0, 0)),
        compiler_params=pltpu.CompilerParams(
            dimension_semantics=("parallel", "parallel")),
    )(q, k, v, mask_f)


# ------------------------------ upsample conv --------------------------------
# Conv1d(2D -> D, kernel=uk, stride=1) as uk shifted matmuls accumulated
# in-kernel (reads x_pad once), with gelu + LayerNorm fused in the epilogue.

def _upsample_kernel(x_ref, w_ref, b_ref, g_ref, beta_ref, o_ref, *, uk, L, eps):
    x = x_ref[...].astype(jnp.float32)                    # (L+uk-1, C)
    C = x.shape[1]
    acc = jnp.zeros(o_ref.shape, jnp.float32)             # (L, D)
    for k in range(uk):                                   # static unroll
        xk = jax.lax.slice(x, (k, 0), (k + L, C))
        acc = acc + jnp.dot(xk.astype(jnp.bfloat16),
                            w_ref[k].astype(jnp.bfloat16),
                            preferred_element_type=jnp.float32)
    y = _gelu(acc + b_ref[...])
    mu = jnp.mean(y, axis=-1, keepdims=True)
    var = jnp.mean((y - mu) ** 2, axis=-1, keepdims=True)
    y = (y - mu) * jax.lax.rsqrt(var + eps) * g_ref[...] + beta_ref[...]
    o_ref[...] = y.astype(o_ref.dtype)


def upsample_conv(x_pad, w3, b, g, beta, *, uk, L, eps=1e-5):
    """x_pad: (B, L+uk-1, 2D); w3: (uk, 2D, D)."""
    B, Lp, C = x_pad.shape
    D = w3.shape[-1]
    return pl.pallas_call(
        functools.partial(_upsample_kernel, uk=uk, L=L, eps=eps),
        out_shape=jax.ShapeDtypeStruct((B, L, D), jnp.float32),
        grid=(B,),
        in_specs=[
            pl.BlockSpec((None, Lp, C), lambda bb: (bb, 0, 0)),
            pl.BlockSpec((uk, C, D), lambda bb: (0, 0, 0)),
            pl.BlockSpec((1, D), lambda bb: (0, 0)),
            pl.BlockSpec((1, D), lambda bb: (0, 0)),
            pl.BlockSpec((1, D), lambda bb: (0, 0)),
        ],
        out_specs=pl.BlockSpec((None, L, D), lambda bb: (bb, 0, 0)),
        compiler_params=pltpu.CompilerParams(dimension_semantics=("parallel",)),
    )(x_pad, w3, b.reshape(1, D), g.reshape(1, D), beta.reshape(1, D))


# --------------------- transformer layer (post-LN, eval) --------------------

def _split_heads(t, H):
    B, S, D = t.shape
    return t.reshape(B, S, H, D // H).transpose(0, 2, 1, 3)   # (B, H, S, Dh)


def transformer_layer(x, key_pad_mask, p, H, window=None):
    # PyTorch TransformerEncoderLayer, norm_first=False, dropout = identity.
    B, S, D = x.shape
    qkv = linear(x, p["wqkv"], p["bqkv"])                     # (B, S, 3D)
    q, k, v = jnp.split(qkv, 3, axis=-1)
    ctx = attention(_split_heads(q, H), _split_heads(k, H), _split_heads(v, H),
                    key_pad_mask, window=window)              # (B, H, S, Dh)
    ctx = ctx.transpose(0, 2, 1, 3).reshape(B, S, D)
    # output projection with residual-add + LayerNorm fused in the epilogue
    x = linear(ctx, p["wo"], p["bo"], residual=x, ln=(p["ln1_g"], p["ln1_b"]))
    ff = linear(x, p["w1"], p["b1"], act="gelu")
    x = linear(ff, p["w2"], p["b2"], residual=x, ln=(p["ln2_g"], p["ln2_b"]))
    return x


# ------------------------------ embedders ------------------------------------

_HASH_PRIMES = (31, 43, 59, 61, 73, 97, 103, 113)


def multi_hash_embed(input_ids, tables, bucket_count):
    # TODO(synk): MultiHashingEmbedder source not provided; deterministic
    # multiplicative-hash slice embeddings (CANINE-style) used instead.
    n_slices = tables.shape[0]
    pieces = []
    for s in range(n_slices):
        buckets = ((input_ids.astype(jnp.int32) + 1) * _HASH_PRIMES[s]) % bucket_count
        pieces.append(tables[s][buckets])
    return jnp.concatenate(pieces, axis=-1)


# ------------------------------ forward pass ---------------------------------

def shiba_forward(params, cfg, input_ids, attention_mask):
    B, S = input_ids.shape
    D = cfg["hidden_size"]
    H = cfg["attention_heads"]
    rate = cfg["downsampling_rate"]
    uk = cfg["upsampling_kernel_size"]

    # char embeddings + learned position embeddings
    char_emb = multi_hash_embed(input_ids, params["embed_tables"],
                                cfg["embedder_bucket_count"])
    char_emb = char_emb + params["pos_emb"][:S][None, :, :]

    # local transformer: block-local attention window + key padding mask
    # TODO(synk): LocalTransformerEncoderLayer source not provided; block-local
    # windowed attention over `local_attention_window`-sized blocks used.
    contextualized_chars = transformer_layer(
        char_emb, attention_mask, params["local_tf"], H,
        window=cfg["local_attention_window"])

    # CLS linear (dropout = identity)
    cls_embedding = linear(contextualized_chars[:, 0:1, :],
                           params["cls_w"], params["cls_b"])

    # downsample conv (kernel = stride = rate) folded into a matmul; contiguous
    # reshape is copy-free; gelu + LayerNorm fused into the matmul epilogue.
    S_mol = S // rate
    patches = contextualized_chars[:, :S_mol * rate, :].reshape(B, S_mol, rate * D)
    molecules = linear(patches, params["ds_w"], params["ds_b"], act="gelu",
                       ln=(params["ds_ln_g"], params["ds_ln_b"]))
    molecules = jnp.concatenate([cls_embedding, molecules], axis=1)

    # MaxPool1d over the float mask, then left-pad with True for the CLS slot
    mask_f = attention_mask.astype(jnp.float32)
    down_mask = jnp.max(mask_f[:, :S_mol * rate].reshape(B, S_mol, rate), axis=-1)
    molecule_mask = jnp.concatenate(
        [jnp.ones((B, 1), jnp.float32), down_mask], axis=1).astype(bool)

    # deep transformer stack
    mol = molecules
    for lp in params["deep_tf"]:
        mol = transformer_layer(mol, molecule_mask, lp, H)
    contextualized_molecules = mol

    molecules_without_cls = contextualized_molecules[:, 1:, :]

    # _repeat_molecules
    repeated = jnp.repeat(molecules_without_cls, rate, axis=1)
    remainder = S % rate
    last = molecules_without_cls[:, -1:, :]
    repeated = jnp.concatenate([repeated, jnp.repeat(last, remainder, axis=1)], axis=1)

    concatenated = jnp.concatenate([contextualized_chars, repeated], axis=2)  # (B,S,2D)

    # _pad_for_convolution_to_same_length (stride=1, dilation=1, kernel=uk)
    l = concatenated.shape[1]
    total_padding = l * 1 - l + 1 * uk - 1 + 1 - 1
    lhs = total_padding // 2
    rhs = total_padding - lhs
    x_pad = jnp.pad(concatenated, ((0, 0), (lhs, rhs), (0, 0)))

    # upsample conv as in-kernel shifted matmuls, gelu + LN fused (dropout = id)
    upsampled = upsample_conv(x_pad, params["us_w"], params["us_b"],
                              params["us_ln_g"], params["us_ln_b"], uk=uk, L=l)

    # predict_indices is None path
    contextualized_cls = contextualized_molecules[:, 0:1, :]
    final_cls = linear(contextualized_cls, params["cls_final_w"],
                       params["cls_final_b"], act="tanh")
    tail = upsampled[:, 1:, :]
    tail = transformer_layer(tail, attention_mask[:, 1:], params["final_tf"], H)
    final_embeddings = jnp.concatenate([final_cls, tail], axis=1)
    return {"embeddings": final_embeddings}


# ------------------------------ parameter init -------------------------------

def _dense(key, shape, scale=0.02):
    return (scale * jax.random.normal(key, shape)).astype(jnp.float32)


def init_tf_layer(key, D, F):
    ks = jax.random.split(key, 4)
    return {
        "wqkv": _dense(ks[0], (D, 3 * D)), "bqkv": jnp.zeros((3 * D,), jnp.float32),
        "wo": _dense(ks[1], (D, D)), "bo": jnp.zeros((D,), jnp.float32),
        "ln1_g": jnp.ones((D,), jnp.float32), "ln1_b": jnp.zeros((D,), jnp.float32),
        "w1": _dense(ks[2], (D, F)), "b1": jnp.zeros((F,), jnp.float32),
        "w2": _dense(ks[3], (F, D)), "b2": jnp.zeros((D,), jnp.float32),
        "ln2_g": jnp.ones((D,), jnp.float32), "ln2_b": jnp.zeros((D,), jnp.float32),
    }


def init_params(key, cfg):
    D = cfg["hidden_size"]
    F = cfg["transformer_ff_size"]
    rate = cfg["downsampling_rate"]
    uk = cfg["upsampling_kernel_size"]
    nsl = cfg["embedder_slice_count"]
    nb = cfg["embedder_bucket_count"]
    d_slice = D // nsl
    ks = jax.random.split(key, 16)

    # Conv1d weights generated in PyTorch layout (out, in, k), folded to matmul form:
    #   downsample: W_mat[k*Cin + c, o] = w[o, c, k]
    #   upsample:   W3[k, c, o]        = w[o, c, k]
    ds_conv_w = _dense(ks[2], (D, D, rate))
    us_conv_w = _dense(ks[3], (D, 2 * D, uk))

    deep_layers = [init_tf_layer(k, D, F)
                   for k in jax.random.split(ks[4], cfg["deep_transformer_stack_layers"])]

    return {
        "embed_tables": _dense(ks[0], (nsl, nb, d_slice)),
        "pos_emb": _dense(ks[1], (cfg["max_length"], D)),
        "local_tf": init_tf_layer(ks[5], D, F),
        "cls_w": _dense(ks[6], (D, D)), "cls_b": jnp.zeros((D,), jnp.float32),
        "ds_w": jnp.transpose(ds_conv_w, (2, 1, 0)).reshape(rate * D, D),
        "ds_b": jnp.zeros((D,), jnp.float32),
        "ds_ln_g": jnp.ones((D,), jnp.float32), "ds_ln_b": jnp.zeros((D,), jnp.float32),
        "deep_tf": deep_layers,
        "us_w": jnp.transpose(us_conv_w, (2, 1, 0)),          # (uk, 2D, D)
        "us_b": jnp.zeros((D,), jnp.float32),
        "us_ln_g": jnp.ones((D,), jnp.float32), "us_ln_b": jnp.zeros((D,), jnp.float32),
        "final_tf": init_tf_layer(ks[7], D, F),
        "cls_final_w": _dense(ks[8], (D, D)),
        "cls_final_b": jnp.zeros((D,), jnp.float32),
    }


# ---------------------------------- main -------------------------------------

if __name__ == "__main__":
    cfg = dict(
        downsampling_rate=4, upsampling_kernel_size=4,
        embedder_slice_count=8, embedder_bucket_count=64,
        hidden_size=32, local_attention_window=8,
        attention_heads=4, transformer_ff_size=64,
        dropout=0.1, activation="gelu", padding_id=0,
        max_length=32, deep_transformer_stack_layers=2,
    )
    assert cfg["max_length"] % cfg["downsampling_rate"] == 0

    B, S = 2, 16
    key = jax.random.PRNGKey(0)
    kp, kid = jax.random.split(key)
    params = init_params(kp, cfg)

    input_ids = jax.random.randint(kid, (B, S), 1, 400, dtype=jnp.int32)
    input_ids = input_ids.at[:, 0].set(CLS_CODEPOINT)
    attention_mask = jnp.zeros((B, S), dtype=bool)  # True = padding (ignored)

    # sanity checks mirroring the reference forward()
    assert input_ids.shape[1] <= cfg["max_length"]
    assert bool(jnp.all(input_ids[:, 0] == CLS_CODEPOINT))

    out = shiba_forward(params, cfg, input_ids, attention_mask)
    emb = jax.block_until_ready(out["embeddings"])
    assert emb.shape == (B, S, cfg["hidden_size"])
    print("KERNEL_OK")
</pallas_src>

<mosaic_0001>
module attributes {stable_mosaic.version = 11 : i64} {
  func.func @_linear_kernel(%arg0: i32, %arg1: i32, %arg2: i32, %arg3: memref<32x32xf32, #tpu.memory_space<vmem>>, %arg4: memref<32x96xf32, #tpu.memory_space<vmem>>, %arg5: memref<1x96xf32, #tpu.memory_space<vmem>>, %arg6: memref<32x96xf32, #tpu.memory_space<vmem>>, %arg7: memref<32x96xf32, #tpu.memory_space<vmem>>) attributes {dimension_semantics = [#tpu.dimension_semantics<parallel>, #tpu.dimension_semantics<parallel>, #tpu.dimension_semantics<arbitrary>], iteration_bounds = array<i64: 1, 1, 1>, scalar_prefetch = 0 : i64, scratch_operands = 1 : i64, tpu.core_type = #tpu.core_type<tc>, window_params = [{transform_indices = @transform_0, window_bounds = array<i64: 32, 32>}, {transform_indices = @transform_1, window_bounds = array<i64: 32, 96>}, {transform_indices = @transform_2, window_bounds = array<i64: 1, 96>}, {transform_indices = @transform_3, window_bounds = array<i64: 32, 96>}]} {
    %c0_i32 = arith.constant 0 : i32
    %0 = arith.cmpi eq, %arg2, %c0_i32 : i32
    %1 = arith.extui %0 : i1 to i32
    %c0_i32_0 = arith.constant 0 : i32
    %2 = arith.cmpi ne, %1, %c0_i32_0 : i32
    scf.if %2 {
      %cst_10 = arith.constant 0.000000e+00 : f32
      %14 = vector.broadcast %cst_10 : f32 to vector<32x96xf32>
      %c0_11 = arith.constant 0 : index
      %c0_12 = arith.constant 0 : index
      %15 = vector.load %arg7[%c0_11, %c0_12] : memref<32x96xf32, #tpu.memory_space<vmem>>, vector<32x96xf32>
      tpu.vector_store %arg7[%c0_11, %c0_12], %14 {strides = array<i32>} : memref<32x96xf32, #tpu.memory_space<vmem>>, vector<32x96xf32>,
    } else {
    }
    %c0 = arith.constant 0 : index
    %c0_1 = arith.constant 0 : index
    %3 = vector.load %arg7[%c0, %c0_1] : memref<32x96xf32, #tpu.memory_space<vmem>>, vector<32x96xf32>
    %c0_2 = arith.constant 0 : index
    %c0_3 = arith.constant 0 : index
    %4 = vector.load %arg3[%c0_2, %c0_3] : memref<32x32xf32, #tpu.memory_space<vmem>>, vector<32x32xf32>
    %5 = arith.truncf %4 : vector<32x32xf32> to vector<32x32xbf16>
    %c0_4 = arith.constant 0 : index
    %c0_5 = arith.constant 0 : index
    %6 = vector.load %arg4[%c0_4, %c0_5] : memref<32x96xf32, #tpu.memory_space<vmem>>, vector<32x96xf32>
    %7 = arith.truncf %6 : vector<32x96xf32> to vector<32x96xbf16>
    %cst = arith.constant dense<0.000000e+00> : vector<32x96xf32>
    %8 = tpu.matmul %5, %7, %cst {dimension_numbers = #tpu.dot_dimension_numbers<[1], [0], [0], [1], [0, 0, 1, 1], [], []>} : vector<32x32xbf16>, vector<32x96xbf16>, vector<32x96xf32> -> vector<32x96xf32>
    %9 = arith.addf %3, %8 : vector<32x96xf32>
    %c0_6 = arith.constant 0 : index
    %c0_7 = arith.constant 0 : index
    %10 = vector.load %arg7[%c0_6, %c0_7] : memref<32x96xf32, #tpu.memory_space<vmem>>, vector<32x96xf32>
    tpu.vector_store %arg7[%c0_6, %c0_7], %9 {strides = array<i32>} : memref<32x96xf32, #tpu.memory_space<vmem>>, vector<32x96xf32>,
    %c0_i32_8 = arith.constant 0 : i32
    %11 = arith.cmpi eq, %arg2, %c0_i32_8 : i32
    %12 = arith.extui %11 : i1 to i32
    %c0_i32_9 = arith.constant 0 : i32
    %13 = arith.cmpi ne, %12, %c0_i32_9 : i32
    scf.if %13 {
      %c0_10 = arith.constant 0 : index
      %c0_11 = arith.constant 0 : index
      %14 = vector.load %arg7[%c0_10, %c0_11] : memref<32x96xf32, #tpu.memory_space<vmem>>, vector<32x96xf32>
      %c0_12 = arith.constant 0 : index
      %c0_13 = arith.constant 0 : index
      %15 = vector.load %arg5[%c0_12, %c0_13] : memref<1x96xf32, #tpu.memory_space<vmem>>, vector<1x96xf32>
      %16 = vector.broadcast %15 : vector<1x96xf32> to vector<32x96xf32>
      %17 = arith.addf %14, %16 : vector<32x96xf32>
      %c0_14 = arith.constant 0 : index
      %c0_15 = arith.constant 0 : index
      %18 = vector.load %arg6[%c0_14, %c0_15] : memref<32x96xf32, #tpu.memory_space<vmem>>, vector<32x96xf32>
      tpu.vector_store %arg6[%c0_14, %c0_15], %17 {strides = array<i32>} : memref<32x96xf32, #tpu.memory_space<vmem>>, vector<32x96xf32>,
    } else {
    }
    return
  }
  func.func @transform_0(%arg0: i32, %arg1: i32, %arg2: i32) -> (i32, i32) {
    %c0_i32 = arith.constant 0 : i32
    return %arg0, %arg2 : i32, i32
  }
  func.func @transform_1(%arg0: i32, %arg1: i32, %arg2: i32) -> (i32, i32) {
    %c0_i32 = arith.constant 0 : i32
    return %arg2, %arg1 : i32, i32
  }
  func.func @transform_2(%arg0: i32, %arg1: i32, %arg2: i32) -> (i32, i32) {
    %c0_i32 = arith.constant 0 : i32
    %c0_i32_0 = arith.constant 0 : i32
    return %c0_i32, %arg1 : i32, i32
  }
  func.func @transform_3(%arg0: i32, %arg1: i32, %arg2: i32) -> (i32, i32) {
    %c0_i32 = arith.constant 0 : i32
    return %arg0, %arg1 : i32, i32
  }
}

</mosaic_0001>

<bundles_post_ra>
// kernel: tpu_custom_call.1
= control target key start
LH: loop header
LB: loop body
LE: loop exit
PB: predicated region body
PF: predicated region fallthrough
CT: control target
= control target key end

     0   :  { %8 = vsyncpa [#allocation4], 0  ;;  %s320_s0 = inlined_call_operand.hbm [shape: f32[32,32], index: 0, kind: input, shape index: {}]   ;;  %s321_s1 = inlined_call_operand.hbm [shape: f32[32,96], index: 1, kind: input, shape index: {}]   ;;  %s322_s2 = inlined_call_operand.vmem [shape: f32[1,96], index: 2, kind: input, shape index: {}]   ;;  %s323_s3 = inlined_call_operand.hbm [shape: f32[32,96], index: 3, kind: output, shape index: {}]  }
   0x1   :  { %9 = vsyncpa [#allocation7], 0 }
   0x2   :  { %10 = vsyncpa [#allocation5], 0  ;;  %s261_s12 = smov [#allocation3]  }
   0x3   :  { %s16_s13 = sshll.u32 %s261_s12, 4  ;;  %s17_s13 = int_to_ptr.vmem [resolvable:$true] %s16_s13 }
   0x4   :  { %s203_s14 = scalar_lea.vmem %s17_s13, 512  ;;  %p208_p1 = scmp.lt.s32.totalorder %s17_s13, %s17_s13 }
   0x5   :  { %p204_p0 = scmp.ne.s32.totalorder %s17_s13, %s203_s14  ;;  %p209_p2 = scmp.lt.s32.totalorder %s203_s14, %s203_s14 }
   0x7   :  { %p210_p3 = por %p209_p2, %p208_p1 }
   0x9   :  { %p211_p4 = pnand %p210_p3, %p204_p0 }
   0xb   :  { %214 = shalt.err (!%p211_p4)
}
   0xc   :  { %s262_s15 = smov 128   ;;  %s263_s16 = smov 8  }
   0xd   :  { %22 = dma.hbm_to_vmem [thread:$0]  %s320_s0, 512, %s17_s13, [#allocation4], %s262_s15, %s262_s15, %s263_s16  }
   0xe   :  { %s264_s19 = smov [#allocation6]  }
   0xf   :  { %s28_s20 = sshll.u32 %s264_s19, 4  ;;  %s29_s20 = int_to_ptr.vmem [resolvable:$true] %s28_s20 }
  0x10   :  { %s223_s21 = scalar_lea.vmem %s29_s20, 512  ;;  %p228_p6 = scmp.lt.s32.totalorder %s29_s20, %s29_s20 }
  0x11   :  { %p224_p5 = scmp.ne.s32.totalorder %s29_s20, %s223_s21  ;;  %p229_p7 = scmp.lt.s32.totalorder %s223_s21, %s223_s21 }
  0x13   :  { %p230_p8 = por %p229_p7, %p228_p6 }
  0x15   :  { %p231_p9 = pnand %p230_p8, %p224_p5 }
  0x17   :  { %234 = shalt.err (!%p231_p9)
}
  0x18   :  { %34 = dma.hbm_to_vmem [thread:$0]  %s321_s1, 512, %s29_s20, [#allocation7], %s262_s15, %s262_s15, %s263_s16  }
  0x19   :  { %255 = dma.done.wait [#allocation4], 512  }
  0x1a   :  { %256 = vsyncadd [#allocation4], 4294966784 }
  0x1b   :  { %257 = dma.done.wait [#allocation7], 512  }
  0x1c   :  { %258 = vsyncadd [#allocation7], 4294966784  ;;  %vm48_vm0 = vcmask 785408   ;;  %v265_v0 = vmov 0.0   ;;  %v65_v1 = vld [vmem:[#allocation6 + $0x10] sm:$0xff]  ;;  %v66_v2 = vld [vmem:[#allocation6 + $0x18] sm:$0xff] }
  0x1d   :  { %51 = vst.msk [vmem:[#allocation2 + $0x10] sm:$0xff] %vm48_vm0, %v265_v0  ;;  %49 = vst.msk [vmem:[#allocation2] sm:$0xff] %vm48_vm0, %v265_v0  ;;  %v63_v3 = vld [vmem:[#allocation6] sm:$0xff]  ;;  %v68_v4 = vpack.c.bf16 %v66_v2, %v65_v1  ;;  %v64_v5 = vld [vmem:[#allocation6 + $0x8] sm:$0xff]  ;;  %vm69_vm1 = vcmask 261120   ;;  %s266_s24 = smov [#allocation8]  }
  0x1e   :  { %50 = vst.msk [vmem:[#allocation2 + $0x8] sm:$0xff] %vm48_vm0, %v265_v0  ;;  %52 = vst.msk [vmem:[#allocation2 + $0x18] sm:$0xff] %vm48_vm0, %v265_v0  ;;  %v57_v6 = vld [vmem:[#allocation3] sm:$0xff]  ;;  %v58_v7 = vld [vmem:[#allocation3 + $0x8] sm:$0xff]  ;;  %v67_v8 = vpack.c.bf16 %v64_v5, %v63_v3  ;;  %s161_s25 = sshll.u32 %s266_s24, 4  ;;  %s162_s25 = int_to_ptr.vmem [resolvable:$true] %s161_s25 }
  0x1f   :  { %v61_v9 = vpack.c.bf16 %v58_v7, %v57_v6  ;;  %181 = vmatprep.subr.bf16.mxu0 %v68_v4  ;;  %v59_v10 = vld [vmem:[#allocation3 + $0x10] sm:$0xff]  ;;  %v60_v11 = vld [vmem:[#allocation3 + $0x18] sm:$0xff]  ;;  %v176_v25 = vld [vmem:[%s322_s2] ss:$0 sm:$0xff]  ;;  %s235_s2 = scalar_lea.vmem %s162_s25, 512  ;;  %p240_p11 = scmp.lt.s32.totalorder %s162_s25, %s162_s25 }
  0x20   :  { %182 = vmatpush3.bf16.msra.mxu0 %v68_v4  ;;  %v62_v12 = vpack.c.bf16 %v60_v11, %v59_v10  ;;  %p236_p10 = scmp.ne.s32.totalorder %s162_s25, %s235_s2  ;;  %p241_p12 = scmp.lt.s32.totalorder %s235_s2, %s235_s2 }
  0x21   :  { %185 = vmatprep.mubr.msk.bf16.mxu0 %vm69_vm1, %v61_v9  ;;  %183 = vmatprep.subr.bf16.mxu0 %v67_v8 }
  0x22   :  { %p242_p13 = por %p241_p12, %p240_p11 }
  0x24   :  { %184 = vmatpush3.bf16.msra.mxu0 %v67_v8  ;;  %v55_v13 = vld [vmem:[#allocation2 + $0x10] sm:$0xff]  ;;  %v53_v15 = vld [vmem:[#allocation2] sm:$0xff]  ;;  %p243_p0 = pnand %p242_p13, %p236_p10 }
  0x25   :  { %v56_v18 = vld [vmem:[#allocation2 + $0x18] sm:$0xff]  ;;  %v54_v21 = vld [vmem:[#allocation2 + $0x8] sm:$0xff] }
  0x27   :  { %186 = vmatmul.mubr.msk.bf16.vlgmr.msra.gmra.mxu0 %vm69_vm1, %v62_v12 }
  0xe7   :  { %v187_v14 = vpop.f32.mrf.mxu0 }
  0xe8   :  { %v127_v16 = vadd.f32 %v187_v14, %v55_v13 }
  0xe9   :  { %v110_v17 = vpop.f32.mrf.mxu0 }
  0xea   :  { %132 = vst.msk [vmem:[#allocation2 + $0x10] sm:$0xff] %vm48_vm0, %v127_v16  ;;  %v125_v19 = vadd.f32 %v110_v17, %v53_v15 }
  0xeb   :  { %v188_v20 = vpop.f32.mrf.mxu0 }
  0xec   :  { %130 = vst.msk [vmem:[#allocation2] sm:$0xff] %vm48_vm0, %v125_v19  ;;  %v128_v22 = vadd.f32 %v188_v20, %v56_v18 }
  0xed   :  { %v113_v23 = vpop.f32.mrf.mxu0 }
  0xee   :  { %133 = vst.msk [vmem:[#allocation2 + $0x18] sm:$0xff] %vm48_vm0, %v128_v22  ;;  %v126_v24 = vadd.f32 %v113_v23, %v54_v21 }
  0xf0   :  { %131 = vst.msk [vmem:[#allocation2 + $0x8] sm:$0xff] %vm48_vm0, %v126_v24 }
  0xf1   :  { %v139_v26 = vld [vmem:[#allocation2 + $0x10] sm:$0xff] }
  0xf2   :  { %v150_v27 = vadd.f32 %v176_v25, %v139_v26 }
  0xf3   :  { %v137_v28 = vld [vmem:[#allocation2] sm:$0xff] }
  0xf4   :  { %v148_v29 = vadd.f32 %v176_v25, %v137_v28  ;;  %154 = vst.msk [vmem:[#allocation8 + $0x10] sm:$0xff] %vm48_vm0, %v150_v27 }
  0xf5   :  { %v140_v30 = vld [vmem:[#allocation2 + $0x18] sm:$0xff] }
  0xf6   :  { %v151_v31 = vadd.f32 %v176_v25, %v140_v30  ;;  %152 = vst.msk [vmem:[#allocation8] sm:$0xff] %vm48_vm0, %v148_v29 }
  0xf7   :  { %v138_v32 = vld [vmem:[#allocation2 + $0x8] sm:$0xff] }
  0xf8   :  { %v149_v33 = vadd.f32 %v176_v25, %v138_v32  ;;  %155 = vst.msk [vmem:[#allocation8 + $0x18] sm:$0xff] %vm48_vm0, %v151_v31 }
  0xfa   :  { %153 = vst.msk [vmem:[#allocation8 + $0x8] sm:$0xff] %vm48_vm0, %v149_v33 }
  0xfb   :  { %246 = shalt.err (!%p243_p0)
}
  0xfc   :  { %167 = dma.vmem_to_hbm [thread:$0]  %s162_s25, 512, %s323_s3, [#allocation5], %s262_s15, %s262_s15, %s263_s16  }
  0xfd   :  { %259 = dma.done.wait [#allocation5], 512  }
  0xfe   :  { %260 = vsyncadd [#allocation5], 4294966784 }
  0xff   :  { %171 = vsyncpa [#allocation4], 1 }
 0x100   :  { %172 = vsyncpa [#allocation7], 1 }
 0x101   :  { %173 = vsyncpa [#allocation5], 1 }

</bundles_post_ra>
